<compile_context>
chip_gen: v5e
topology: v5e:2x2
jax: 0.10.0
libtpu: 0.0.40
codegen_flags: <defaults>
</compile_context>

<pallas_src>
import functools

import jax
import jax.numpy as jnp
from jax.experimental import pallas as pl
from jax.experimental.pallas import tpu as pltpu

LANES = 128
SUBLANES = 8
# Below this element count, pallas_call launch overhead dominates; a fused XLA
# elementwise op is faster and avoids extra compile-cache entries.
_FAST_PATH_ELEMS = 65536


def _round_up(x: int, m: int) -> int:
    return ((x + m - 1) // m) * m


def _reference(a, b):
    # a + a*b == a + b*a == a*b + a == b*a + a exactly in IEEE arithmetic.
    return a + a * b


def _distributive_kernel(a_ref, b_ref, o_ref):
    a = a_ref[...]
    o_ref[...] = a + a * b_ref[...]


@functools.lru_cache(maxsize=1)
def _tensorcores_per_device() -> int:
    """Best-effort TensorCores per JAX device (v5e/v6e: 1; v7x / megacore: 2).

    Only used to decide whether to split a single-block grid, so the
    conservative default of 1 is always correct (just not maximally parallel).
    """
    try:
        info = pltpu.get_tpu_info()
        for name in ("num_cores", "core_count", "num_tensorcores",
                     "tensorcore_count", "num_cores_per_chip"):
            val = getattr(info, name, None)
            if isinstance(val, int) and 0 < val <= 8:
                return val
    except Exception:
        pass
    try:
        kind = jax.devices()[0].device_kind.lower()
        if "lite" in kind or "v5e" in kind or "v6e" in kind:
            return 1
        if "v7" in kind or "v4" in kind or "v5p" in kind or "v5" in kind:
            return 2
    except Exception:
        pass
    return 1


def distributive(a, b, variation: int = 0, *, target_block_bytes: int = 2 << 20):
    """Pallas implementation of TestModule.forward(a, b) for any variation."""
    del variation  # numerically identical for all four variations
    assert a.shape == b.shape and a.dtype == b.dtype
    orig_shape = a.shape
    n = a.size
    if n == 0:
        return a
    itemsize = jnp.dtype(a.dtype).itemsize

    # Tiny inputs: fixed kernel-launch overhead dominates; use fused XLA op.
    if n < _FAST_PATH_ELEMS:
        return _reference(a, b)

    # Widest lane-dense width (multiple of 128) that divides n exactly, so the
    # flatten/reshape is a free row-major bitcast (no pad / copy passes).
    width = 0
    for cand in (1024, 512, 256, 128):
        if n % cand == 0:
            width = cand
            break
    if width == 0:
        # TODO(synk): an in-kernel masked tail (1D blocks + masked store) could
        # keep this on the Pallas path; a fused XLA elementwise op is already
        # at the 3N-byte HBM roofline, so it is the cheapest correct fallback
        # (any pad/slice or split/concat wrapper adds extra full HBM passes).
        return _reference(a, b)

    rows = n // width
    a2 = a.reshape(rows, width)
    b2 = b.reshape(rows, width)

    # Row-block granularity: multiple of the packed-sublane count for the dtype
    # (8 for f32, 16 for bf16, 32 for int8) so sublane packing stays legal.
    row_align = max(SUBLANES, 32 // itemsize)

    # ~2 MiB per-input block: ~85%+ of the HBM roofline and amortizes the
    # ~0.35 us/step grid overhead; 3 arrays x 2 buffers x 2 MiB ~= 12 MiB VMEM.
    bm = max(row_align,
             (target_block_bytes // (width * itemsize)) // row_align * row_align)
    bm = min(bm, _round_up(rows, row_align))

    # Multi-TC chips: make sure there are at least `ncores` grid steps so
    # dimension_semantics=("parallel",) can shard work across TensorCores.
    # Single-TC chips keep one step for whole-slab inputs (no extra overhead).
    ncores = _tensorcores_per_device()
    if ncores > 1 and rows >= ncores * row_align and pl.cdiv(rows, bm) < ncores:
        bm = _round_up(pl.cdiv(rows, ncores), row_align)

    grid = (pl.cdiv(rows, bm),)  # last block is masked if bm does not divide rows

    out2 = pl.pallas_call(
        _distributive_kernel,
        out_shape=jax.ShapeDtypeStruct((rows, width), a.dtype),
        grid_spec=pltpu.PrefetchScalarGridSpec(
            num_scalar_prefetch=0,
            grid=grid,
            in_specs=[
                pl.BlockSpec((bm, width), lambda i: (i, 0)),
                pl.BlockSpec((bm, width), lambda i: (i, 0)),
            ],
            out_specs=pl.BlockSpec((bm, width), lambda i: (i, 0)),
        ),
        compiler_params=pltpu.CompilerParams(
            dimension_semantics=("parallel",),
            vmem_limit_bytes=32 << 20,
        ),
    )(a2, b2)

    return out2.reshape(orig_shape)


if __name__ == "__main__":
    key = jax.random.PRNGKey(0)
    ka, kb, kc, kd, ke, kf, kg, kh = jax.random.split(key, 8)

    ok = True

    # 1) Small shape typical of the module's usage (XLA fast path).
    shape_small = (2, 4, 16, 16)
    a_s = jax.random.normal(ka, shape_small, dtype=jnp.float32)
    b_s = jax.random.normal(kb, shape_small, dtype=jnp.float32)
    ref_s = a_s + a_s * b_s
    for variation in range(4):
        out = distributive(a_s, b_s, variation=variation)
        jax.block_until_ready(out)
        ok &= bool(jnp.allclose(out, ref_s, atol=1e-6, rtol=1e-6))

    # 2) Shape large enough to take the Pallas kernel path (lane-aligned).
    shape_big = (4, 64, 256)  # 65536 elements -> kernel path
    a_g = jax.random.normal(kc, shape_big, dtype=jnp.float32)
    b_g = jax.random.normal(kd, shape_big, dtype=jnp.float32)
    ref_g = a_g + a_g * b_g
    for variation in range(4):
        out = distributive(a_g, b_g, variation=variation)
        jax.block_until_ready(out)
        ok &= bool(jnp.allclose(out, ref_g, atol=1e-6, rtol=1e-6))

    # 3) Multi-block grid with a masked (partial) last block.
    shape_multi = (136, 512)  # 69632 elements, rows=68 at width=1024
    a_m = jax.random.normal(ke, shape_multi, dtype=jnp.float32)
    b_m = jax.random.normal(kf, shape_multi, dtype=jnp.float32)
    out_m = distributive(a_m, b_m, variation=1, target_block_bytes=128 * 1024)
    jax.block_until_ready(out_m)
    ok &= bool(jnp.allclose(out_m, a_m + a_m * b_m, atol=1e-6, rtol=1e-6))

    # 4) Unaligned shape (exercises the fused-XLA fallback path).
    shape_odd = (3, 5, 7)
    a_o = jax.random.normal(kg, shape_odd, dtype=jnp.float32)
    b_o = jax.random.normal(kh, shape_odd, dtype=jnp.float32)
    out_o = distributive(a_o, b_o, variation=2)
    jax.block_until_ready(out_o)
    ok &= bool(jnp.allclose(out_o, a_o + a_o * b_o, atol=1e-6, rtol=1e-6))

    if ok:
        print("KERNEL_OK")
</pallas_src>

<mosaic_0001>
module attributes {stable_mosaic.version = 11 : i64} {
  func.func @_distributive_kernel(%arg0: i32, %arg1: memref<64x1024xf32, #tpu.memory_space<vmem>>, %arg2: memref<64x1024xf32, #tpu.memory_space<vmem>>, %arg3: memref<64x1024xf32, #tpu.memory_space<vmem>>) attributes {dimension_semantics = [#tpu.dimension_semantics<parallel>], iteration_bounds = array<i64: 1>, scalar_prefetch = 0 : i64, scratch_operands = 0 : i64, tpu.core_type = #tpu.core_type<tc>, window_params = [{transform_indices = @transform_0, window_bounds = array<i64: 64, 1024>}, {transform_indices = @transform_1, window_bounds = array<i64: 64, 1024>}, {transform_indices = @transform_2, window_bounds = array<i64: 64, 1024>}]} {
    %c0 = arith.constant 0 : index
    %c0_0 = arith.constant 0 : index
    %0 = vector.load %arg1[%c0, %c0_0] : memref<64x1024xf32, #tpu.memory_space<vmem>>, vector<64x1024xf32>
    %c0_1 = arith.constant 0 : index
    %c0_2 = arith.constant 0 : index
    %1 = vector.load %arg2[%c0_1, %c0_2] : memref<64x1024xf32, #tpu.memory_space<vmem>>, vector<64x1024xf32>
    %2 = arith.mulf %0, %1 : vector<64x1024xf32>
    %3 = arith.addf %0, %2 : vector<64x1024xf32>
    %c0_3 = arith.constant 0 : index
    %c0_4 = arith.constant 0 : index
    %4 = vector.load %arg3[%c0_3, %c0_4] : memref<64x1024xf32, #tpu.memory_space<vmem>>, vector<64x1024xf32>
    tpu.vector_store %arg3[%c0_3, %c0_4], %3 {strides = array<i32>} : memref<64x1024xf32, #tpu.memory_space<vmem>>, vector<64x1024xf32>,
    return
  }
  func.func @transform_0(%arg0: i32) -> (i32, i32) {
    %c0_i32 = arith.constant 0 : i32
    %c0_i32_0 = arith.constant 0 : i32
    return %arg0, %c0_i32 : i32, i32
  }
  func.func @transform_1(%arg0: i32) -> (i32, i32) {
    %c0_i32 = arith.constant 0 : i32
    %c0_i32_0 = arith.constant 0 : i32
    return %arg0, %c0_i32 : i32, i32
  }
  func.func @transform_2(%arg0: i32) -> (i32, i32) {
    %c0_i32 = arith.constant 0 : i32
    %c0_i32_0 = arith.constant 0 : i32
    return %arg0, %c0_i32 : i32, i32
  }
}

</mosaic_0001>

<bundles_post_ra>
// kernel: tpu_custom_call.1
= control target key start
LH: loop header
LB: loop body
LE: loop exit
PB: predicated region body
PF: predicated region fallthrough
CT: control target
= control target key end

     0   :  { %7 = vsyncpa [#allocation3], 0  ;;  %s505_s0 = inlined_call_operand.hbm [shape: f32[64,1024], index: 0, kind: input, shape index: {}]   ;;  %s506_s1 = inlined_call_operand.hbm [shape: f32[64,1024], index: 1, kind: input, shape index: {}]   ;;  %s507_s2 = inlined_call_operand.hbm [shape: f32[64,1024], index: 2, kind: output, shape index: {}]  }
   0x1   :  { %8 = vsyncpa [#allocation6], 0 }
   0x2   :  { %9 = vsyncpa [#allocation4], 0  ;;  %s14_s11 = sshll.u32 %s505_s0, 4  ;;  %s467_s12 = smov [#allocation2]   ;;  %s15_s11 = int_to_ptr.hbm [resolvable:$true] %s14_s11 }
   0x3   :  { %s16_s13 = sshll.u32 %s467_s12, 4  ;;  %s27_s16 = sshll.u32 %s506_s1, 4  ;;  %s17_s13 = int_to_ptr.vmem [resolvable:$true] %s16_s13  ;;  %s28_s16 = int_to_ptr.hbm [resolvable:$true] %s27_s16 }
   0x4   :  { %s468_s17 = smov 1024   ;;  %s469_s18 = smov 64  }
   0x5   :  { %22 = dma.hbm_to_vmem [thread:$0]  %s15_s11, 8192, %s17_s13, [#allocation3], %s468_s17, %s468_s17, %s469_s18  }
   0x6   :  { %s470_s19 = smov [#allocation5]  }
   0x7   :  { %s29_s20 = sshll.u32 %s470_s19, 4  ;;  %s30_s20 = int_to_ptr.vmem [resolvable:$true] %s29_s20 }
   0x8   :  { %35 = dma.hbm_to_vmem [thread:$0]  %s28_s16, 8192, %s30_s20, [#allocation6], %s468_s17, %s468_s17, %s469_s18  }
   0x9   :  { %461 = dma.done.wait [#allocation3], 8192  }
   0xa   :  { %462 = vsyncadd [#allocation3], 4294959104 }
   0xb   :  { %463 = dma.done.wait [#allocation6], 8192  }
   0xc   :  { %464 = vsyncadd [#allocation6], 4294959104  ;;  %v44_v0 = vld [vmem:[#allocation2] sm:$0xff]  ;;  %v45_v2 = vld [vmem:[#allocation2 + $0x8] sm:$0xff]  ;;  %s471_s0 = smov [#allocation7]   ;;  %s370_s23 = sshll.u32 %s507_s2, 4  ;;  %s371_s23 = int_to_ptr.hbm [resolvable:$true] %s370_s23 }
   0xd   :  { %v108_v1 = vld [vmem:[#allocation5] sm:$0xff]  ;;  %v109_v4 = vld [vmem:[#allocation5 + $0x8] sm:$0xff]  ;;  %v46_v5 = vld [vmem:[#allocation2 + $0x10] sm:$0xff]  ;;  %s368_s1 = sshll.u32 %s471_s0, 4  ;;  %s369_s1 = int_to_ptr.vmem [resolvable:$true] %s368_s1 }
   0xe   :  { %v172_v3 = vmul.f32 %v108_v1, %v44_v0  ;;  %v110_v6 = vld [vmem:[#allocation5 + $0x10] sm:$0xff]  ;;  %v173_v7 = vmul.f32 %v109_v4, %v45_v2  ;;  %v47_v9 = vld [vmem:[#allocation2 + $0x18] sm:$0xff]  ;;  %v48_v11 = vld [vmem:[#allocation2 + $0x20] sm:$0xff] }
   0xf   :  { %v174_v8 = vmul.f32 %v110_v6, %v46_v5  ;;  %v111_v10 = vld [vmem:[#allocation5 + $0x18] sm:$0xff]  ;;  %v112_v14 = vld [vmem:[#allocation5 + $0x20] sm:$0xff]  ;;  %v49_v15 = vld [vmem:[#allocation2 + $0x28] sm:$0xff] }
  0x10   :  { %v236_v12 = vadd.f32 %v172_v3, %v44_v0  ;;  %v175_v13 = vmul.f32 %v111_v10, %v47_v9  ;;  %v113_v16 = vld [vmem:[#allocation5 + $0x28] sm:$0xff]  ;;  %v237_v17 = vadd.f32 %v173_v7, %v45_v2  ;;  %v176_v19 = vmul.f32 %v112_v14, %v48_v11  ;;  %v50_v21 = vld [vmem:[#allocation2 + $0x30] sm:$0xff]  ;;  %v51_v23 = vld [vmem:[#allocation2 + $0x38] sm:$0xff] }
  0x11   :  { %v238_v18 = vadd.f32 %v174_v8, %v46_v5  ;;  %v177_v20 = vmul.f32 %v113_v16, %v49_v15  ;;  %v114_v22 = vld [vmem:[#allocation5 + $0x30] sm:$0xff]  ;;  %v115_v26 = vld [vmem:[#allocation5 + $0x38] sm:$0xff]  ;;  %v52_v27 = vld [vmem:[#allocation2 + $0x40] sm:$0xff] }
  0x12   :  { %300 = vst [vmem:[#allocation7] sm:$0xff] %v236_v12  ;;  %v239_v24 = vadd.f32 %v175_v13, %v47_v9  ;;  %v178_v25 = vmul.f32 %v114_v22, %v50_v21  ;;  %v116_v28 = vld [vmem:[#allocation5 + $0x40] sm:$0xff]  ;;  %v240_v29 = vadd.f32 %v176_v19, %v48_v11  ;;  %v179_v31 = vmul.f32 %v115_v26, %v51_v23  ;;  %v53_v33 = vld [vmem:[#allocation2 + $0x48] sm:$0xff]  ;;  %v54_v35 = vld [vmem:[#allocation2 + $0x50] sm:$0xff] }
  0x13   :  { %301 = vst [vmem:[#allocation7 + $0x8] sm:$0xff] %v237_v17  ;;  %v241_v30 = vadd.f32 %v177_v20, %v49_v15  ;;  %v180_v32 = vmul.f32 %v116_v28, %v52_v27  ;;  %v117_v34 = vld [vmem:[#allocation5 + $0x48] sm:$0xff]  ;;  %v118_v38 = vld [vmem:[#allocation5 + $0x50] sm:$0xff]  ;;  %v55_v39 = vld [vmem:[#allocation2 + $0x58] sm:$0xff] }
  0x14   :  { %302 = vst [vmem:[#allocation7 + $0x10] sm:$0xff] %v238_v18  ;;  %v242_v36 = vadd.f32 %v178_v25, %v50_v21  ;;  %v181_v37 = vmul.f32 %v117_v34, %v53_v33  ;;  %v119_v40 = vld [vmem:[#allocation5 + $0x58] sm:$0xff]  ;;  %v243_v41 = vadd.f32 %v179_v31, %v51_v23  ;;  %v182_v42 = vmul.f32 %v118_v38, %v54_v35  ;;  %v56_v44 = vld [vmem:[#allocation2 + $0x60] sm:$0xff]  ;;  %v57_v46 = vld [vmem:[#allocation2 + $0x68] sm:$0xff] }
  0x15   :  { %303 = vst [vmem:[#allocation7 + $0x18] sm:$0xff] %v239_v24  ;;  %v183_v43 = vmul.f32 %v119_v40, %v55_v39  ;;  %v120_v45 = vld [vmem:[#allocation5 + $0x60] sm:$0xff]  ;;  %v244_v47 = vadd.f32 %v180_v32, %v52_v27  ;;  %v121_v49 = vld [vmem:[#allocation5 + $0x68] sm:$0xff]  ;;  %v58_v50 = vld [vmem:[#allocation2 + $0x70] sm:$0xff] }
  0x16   :  { %304 = vst [vmem:[#allocation7 + $0x20] sm:$0xff] %v240_v29  ;;  %v184_v48 = vmul.f32 %v120_v45, %v56_v44  ;;  %v122_v51 = vld [vmem:[#allocation5 + $0x70] sm:$0xff]  ;;  %v245_v52 = vadd.f32 %v181_v37, %v53_v33  ;;  %v185_v53 = vmul.f32 %v121_v49, %v57_v46  ;;  %v59_v54 = vld [vmem:[#allocation2 + $0x78] sm:$0xff]  ;;  %v60_v56 = vld [vmem:[#allocation2 + $0x80] sm:$0xff]  ;;  %v246_v57 = vadd.f32 %v182_v42, %v54_v35 }
  0x17   :  { %305 = vst [vmem:[#allocation7 + $0x28] sm:$0xff] %v241_v30  ;;  %v123_v55 = vld [vmem:[#allocation5 + $0x78] sm:$0xff]  ;;  %v186_v58 = vmul.f32 %v122_v51, %v58_v50  ;;  %v124_v59 = vld [vmem:[#allocation5 + $0x80] sm:$0xff]  ;;  %v61_v60 = vld [vmem:[#allocation2 + $0x88] sm:$0xff]  ;;  %v247_v62 = vadd.f32 %v183_v43, %v55_v39 }
  0x18   :  { %306 = vst [vmem:[#allocation7 + $0x30] sm:$0xff] %v242_v36  ;;  %v125_v61 = vld [vmem:[#allocation5 + $0x88] sm:$0xff]  ;;  %v187_v63 = vmul.f32 %v123_v55, %v59_v54  ;;  %v62_v0 = vld [vmem:[#allocation2 + $0x90] sm:$0xff]  ;;  %v248_v2 = vadd.f32 %v184_v48, %v56_v44  ;;  %v188_v3 = vmul.f32 %v124_v59, %v60_v56  ;;  %v63_v4 = vld [vmem:[#allocation2 + $0x98] sm:$0xff]  ;;  %v249_v6 = vadd.f32 %v185_v53, %v57_v46 }
  0x19   :  { %307 = vst [vmem:[#allocation7 + $0x38] sm:$0xff] %v243_v41  ;;  %v126_v1 = vld [vmem:[#allocation5 + $0x90] sm:$0xff]  ;;  %v127_v5 = vld [vmem:[#allocation5 + $0x98] sm:$0xff]  ;;  %v189_v7 = vmul.f32 %v125_v61, %v61_v60  ;;  %v64_v8 = vld [vmem:[#allocation2 + $0xa0] sm:$0xff]  ;;  %v250_v10 = vadd.f32 %v186_v58, %v58_v50 }
  0x1a   :  { %308 = vst [vmem:[#allocation7 + $0x40] sm:$0xff] %v244_v47  ;;  %v128_v9 = vld [vmem:[#allocation5 + $0xa0] sm:$0xff]  ;;  %v190_v11 = vmul.f32 %v126_v1, %v62_v0  ;;  %v65_v12 = vld [vmem:[#allocation2 + $0xa8] sm:$0xff]  ;;  %v251_v14 = vadd.f32 %v187_v63, %v59_v54  ;;  %v191_v15 = vmul.f32 %v127_v5, %v63_v4  ;;  %v66_v16 = vld [vmem:[#allocation2 + $0xb0] sm:$0xff]  ;;  %v252_v18 = vadd.f32 %v188_v3, %v60_v56 }
  0x1b   :  { %309 = vst [vmem:[#allocation7 + $0x48] sm:$0xff] %v245_v52  ;;  %v129_v13 = vld [vmem:[#allocation5 + $0xa8] sm:$0xff]  ;;  %v130_v17 = vld [vmem:[#allocation5 + $0xb0] sm:$0xff]  ;;  %v192_v19 = vmul.f32 %v128_v9, %v64_v8  ;;  %v67_v20 = vld [vmem:[#allocation2 + $0xb8] sm:$0xff]  ;;  %v253_v22 = vadd.f32 %v189_v7, %v61_v60 }
  0x1c   :  { %310 = vst [vmem:[#allocation7 + $0x50] sm:$0xff] %v246_v57  ;;  %v131_v21 = vld [vmem:[#allocation5 + $0xb8] sm:$0xff]  ;;  %v193_v23 = vmul.f32 %v129_v13, %v65_v12  ;;  %v68_v24 = vld [vmem:[#allocation2 + $0xc0] sm:$0xff]  ;;  %v254_v26 = vadd.f32 %v190_v11, %v62_v0  ;;  %v194_v27 = vmul.f32 %v130_v17, %v66_v16  ;;  %v69_v28 = vld [vmem:[#allocation2 + $0xc8] sm:$0xff]  ;;  %v255_v30 = vadd.f32 %v191_v15, %v63_v4 }
  0x1d   :  { %311 = vst [vmem:[#allocation7 + $0x58] sm:$0xff] %v247_v62  ;;  %v132_v25 = vld [vmem:[#allocation5 + $0xc0] sm:$0xff]  ;;  %v133_v29 = vld [vmem:[#allocation5 + $0xc8] sm:$0xff]  ;;  %v195_v31 = vmul.f32 %v131_v21, %v67_v20  ;;  %v70_v32 = vld [vmem:[#allocation2 + $0xd0] sm:$0xff]  ;;  %v256_v34 = vadd.f32 %v192_v19, %v64_v8 }
  0x1e   :  { %312 = vst [vmem:[#allocation7 + $0x60] sm:$0xff] %v248_v2  ;;  %v134_v33 = vld [vmem:[#allocation5 + $0xd0] sm:$0xff]  ;;  %v196_v35 = vmul.f32 %v132_v25, %v68_v24  ;;  %v71_v36 = vld [vmem:[#allocation2 + $0xd8] sm:$0xff]  ;;  %v257_v38 = vadd.f32 %v193_v23, %v65_v12  ;;  %v197_v39 = vmul.f32 %v133_v29, %v69_v28  ;;  %v72_v40 = vld [vmem:[#allocation2 + $0xe0] sm:$0xff]  ;;  %v258_v42 = vadd.f32 %v194_v27, %v66_v16 }
  0x1f   :  { %313 = vst [vmem:[#allocation7 + $0x68] sm:$0xff] %v249_v6  ;;  %v135_v37 = vld [vmem:[#allocation5 + $0xd8] sm:$0xff]  ;;  %v136_v41 = vld [vmem:[#allocation5 + $0xe0] sm:$0xff]  ;;  %v198_v43 = vmul.f32 %v134_v33, %v70_v32  ;;  %v73_v44 = vld [vmem:[#allocation2 + $0xe8] sm:$0xff]  ;;  %v259_v46 = vadd.f32 %v195_v31, %v67_v20 }
  0x20   :  { %314 = vst [vmem:[#allocation7 + $0x70] sm:$0xff] %v250_v10  ;;  %v137_v45 = vld [vmem:[#allocation5 + $0xe8] sm:$0xff]  ;;  %v199_v47 = vmul.f32 %v135_v37, %v71_v36  ;;  %v74_v48 = vld [vmem:[#allocation2 + $0xf0] sm:$0xff]  ;;  %v260_v50 = vadd.f32 %v196_v35, %v68_v24  ;;  %v200_v51 = vmul.f32 %v136_v41, %v72_v40  ;;  %v75_v52 = vld [vmem:[#allocation2 + $0xf8] sm:$0xff]  ;;  %v261_v54 = vadd.f32 %v197_v39, %v69_v28 }
  0x21   :  { %315 = vst [vmem:[#allocation7 + $0x78] sm:$0xff] %v251_v14  ;;  %v138_v49 = vld [vmem:[#allocation5 + $0xf0] sm:$0xff]  ;;  %v139_v53 = vld [vmem:[#allocation5 + $0xf8] sm:$0xff]  ;;  %v201_v55 = vmul.f32 %v137_v45, %v73_v44  ;;  %v76_v56 = vld [vmem:[#allocation2 + $0x100] sm:$0xff]  ;;  %v262_v58 = vadd.f32 %v198_v43, %v70_v32 }
  0x22   :  { %316 = vst [vmem:[#allocation7 + $0x80] sm:$0xff] %v252_v18  ;;  %v140_v57 = vld [vmem:[#allocation5 + $0x100] sm:$0xff]  ;;  %v202_v59 = vmul.f32 %v138_v49, %v74_v48  ;;  %v77_v60 = vld [vmem:[#allocation2 + $0x108] sm:$0xff]  ;;  %v263_v62 = vadd.f32 %v199_v47, %v71_v36  ;;  %v203_v63 = vmul.f32 %v139_v53, %v75_v52  ;;  %v78_v0 = vld [vmem:[#allocation2 + $0x110] sm:$0xff]  ;;  %v264_v2 = vadd.f32 %v200_v51, %v72_v40 }
  0x23   :  { %317 = vst [vmem:[#allocation7 + $0x88] sm:$0xff] %v253_v22  ;;  %v141_v61 = vld [vmem:[#allocation5 + $0x108] sm:$0xff]  ;;  %v142_v1 = vld [vmem:[#allocation5 + $0x110] sm:$0xff]  ;;  %v204_v3 = vmul.f32 %v140_v57, %v76_v56  ;;  %v79_v4 = vld [vmem:[#allocation2 + $0x118] sm:$0xff]  ;;  %v265_v6 = vadd.f32 %v201_v55, %v73_v44 }
  0x24   :  { %318 = vst [vmem:[#allocation7 + $0x90] sm:$0xff] %v254_v26  ;;  %v143_v5 = vld [vmem:[#allocation5 + $0x118] sm:$0xff]  ;;  %v205_v7 = vmul.f32 %v141_v61, %v77_v60  ;;  %v80_v8 = vld [vmem:[#allocation2 + $0x120] sm:$0xff]  ;;  %v266_v10 = vadd.f32 %v202_v59, %v74_v48  ;;  %v206_v11 = vmul.f32 %v142_v1, %v78_v0  ;;  %v81_v12 = vld [vmem:[#allocation2 + $0x128] sm:$0xff]  ;;  %v267_v14 = vadd.f32 %v203_v63, %v75_v52 }
  0x25   :  { %319 = vst [vmem:[#allocation7 + $0x98] sm:$0xff] %v255_v30  ;;  %v144_v9 = vld [vmem:[#allocation5 + $0x120] sm:$0xff]  ;;  %v145_v13 = vld [vmem:[#allocation5 + $0x128] sm:$0xff]  ;;  %v207_v15 = vmul.f32 %v143_v5, %v79_v4  ;;  %v82_v16 = vld [vmem:[#allocation2 + $0x130] sm:$0xff]  ;;  %v268_v18 = vadd.f32 %v204_v3, %v76_v56 }
  0x26   :  { %320 = vst [vmem:[#allocation7 + $0xa0] sm:$0xff] %v256_v34  ;;  %v146_v17 = vld [vmem:[#allocation5 + $0x130] sm:$0xff]  ;;  %v208_v19 = vmul.f32 %v144_v9, %v80_v8  ;;  %v83_v20 = vld [vmem:[#allocation2 + $0x138] sm:$0xff]  ;;  %v269_v22 = vadd.f32 %v205_v7, %v77_v60  ;;  %v209_v23 = vmul.f32 %v145_v13, %v81_v12  ;;  %v84_v24 = vld [vmem:[#allocation2 + $0x140] sm:$0xff]  ;;  %v270_v26 = vadd.f32 %v206_v11, %v78_v0 }
  0x27   :  { %321 = vst [vmem:[#allocation7 + $0xa8] sm:$0xff] %v257_v38  ;;  %v147_v21 = vld [vmem:[#allocation5 + $0x138] sm:$0xff]  ;;  %v148_v25 = vld [vmem:[#allocation5 + $0x140] sm:$0xff]  ;;  %v210_v27 = vmul.f32 %v146_v17, %v82_v16  ;;  %v85_v28 = vld [vmem:[#allocation2 + $0x148] sm:$0xff]  ;;  %v271_v30 = vadd.f32 %v207_v15, %v79_v4 }
  0x28   :  { %322 = vst [vmem:[#allocation7 + $0xb0] sm:$0xff] %v258_v42  ;;  %v149_v29 = vld [vmem:[#allocation5 + $0x148] sm:$0xff]  ;;  %v211_v31 = vmul.f32 %v147_v21, %v83_v20  ;;  %v86_v32 = vld [vmem:[#allocation2 + $0x150] sm:$0xff]  ;;  %v272_v34 = vadd.f32 %v208_v19, %v80_v8  ;;  %v212_v35 = vmul.f32 %v148_v25, %v84_v24  ;;  %v87_v36 = vld [vmem:[#allocation2 + $0x158] sm:$0xff]  ;;  %v273_v38 = vadd.f32 %v209_v23, %v81_v12 }
  0x29   :  { %323 = vst [vmem:[#allocation7 + $0xb8] sm:$0xff] %v259_v46  ;;  %v150_v33 = vld [vmem:[#allocation5 + $0x150] sm:$0xff]  ;;  %v151_v37 = vld [vmem:[#allocation5 + $0x158] sm:$0xff]  ;;  %v213_v39 = vmul.f32 %v149_v29, %v85_v28  ;;  %v88_v40 = vld [vmem:[#allocation2 + $0x160] sm:$0xff]  ;;  %v274_v42 = vadd.f32 %v210_v27, %v82_v16 }
  0x2a   :  { %324 = vst [vmem:[#allocation7 + $0xc0] sm:$0xff] %v260_v50  ;;  %v152_v41 = vld [vmem:[#allocation5 + $0x160] sm:$0xff]  ;;  %v214_v43 = vmul.f32 %v150_v33, %v86_v32  ;;  %v89_v44 = vld [vmem:[#allocation2 + $0x168] sm:$0xff]  ;;  %v275_v46 = vadd.f32 %v211_v31, %v83_v20  ;;  %v215_v47 = vmul.f32 %v151_v37, %v87_v36  ;;  %v90_v48 = vld [vmem:[#allocation2 + $0x170] sm:$0xff]  ;;  %v276_v50 = vadd.f32 %v212_v35, %v84_v24 }
  0x2b   :  { %325 = vst [vmem:[#allocation7 + $0xc8] sm:$0xff] %v261_v54  ;;  %v153_v45 = vld [vmem:[#allocation5 + $0x168] sm:$0xff]  ;;  %v154_v49 = vld [vmem:[#allocation5 + $0x170] sm:$0xff]  ;;  %v216_v51 = vmul.f32 %v152_v41, %v88_v40  ;;  %v91_v52 = vld [vmem:[#allocation2 + $0x178] sm:$0xff]  ;;  %v277_v54 = vadd.f32 %v213_v39, %v85_v28 }
  0x2c   :  { %326 = vst [vmem:[#allocation7 + $0xd0] sm:$0xff] %v262_v58  ;;  %v155_v53 = vld [vmem:[#allocation5 + $0x178] sm:$0xff]  ;;  %v217_v55 = vmul.f32 %v153_v45, %v89_v44  ;;  %v92_v56 = vld [vmem:[#allocation2 + $0x180] sm:$0xff]  ;;  %v278_v58 = vadd.f32 %v214_v43, %v86_v32  ;;  %v218_v59 = vmul.f32 %v154_v49, %v90_v48  ;;  %v93_v60 = vld [vmem:[#allocation2 + $0x188] sm:$0xff] }
  0x2d   :  { %327 = vst [vmem:[#allocation7 + $0xd8] sm:$0xff] %v263_v62  ;;  %v156_v57 = vld [vmem:[#allocation5 + $0x180] sm:$0xff]  ;;  %v157_v61 = vld [vmem:[#allocation5 + $0x188] sm:$0xff]  ;;  %v279_v62 = vadd.f32 %v215_v47, %v87_v36  ;;  %v219_v63 = vmul.f32 %v155_v53, %v91_v52  ;;  %v94_v0 = vld [vmem:[#allocation2 + $0x190] sm:$0xff] }
  0x2e   :  { %328 = vst [vmem:[#allocation7 + $0xe0] sm:$0xff] %v264_v2  ;;  %v158_v1 = vld [vmem:[#allocation5 + $0x190] sm:$0xff]  ;;  %v280_v2 = vadd.f32 %v216_v51, %v88_v40  ;;  %v220_v3 = vmul.f32 %v156_v57, %v92_v56  ;;  %v95_v4 = vld [vmem:[#allocation2 + $0x198] sm:$0xff]  ;;  %v221_v7 = vmul.f32 %v157_v61, %v93_v60  ;;  %v96_v8 = vld [vmem:[#allocation2 + $0x1a0] sm:$0xff] }
  0x2f   :  { %329 = vst [vmem:[#allocation7 + $0xe8] sm:$0xff] %v265_v6  ;;  %v159_v5 = vld [vmem:[#allocation5 + $0x198] sm:$0xff]  ;;  %v281_v6 = vadd.f32 %v217_v55, %v89_v44  ;;  %v160_v9 = vld [vmem:[#allocation5 + $0x1a0] sm:$0xff]  ;;  %v222_v11 = vmul.f32 %v158_v1, %v94_v0  ;;  %v97_v12 = vld [vmem:[#allocation2 + $0x1a8] sm:$0xff] }
  0x30   :  { %330 = vst [vmem:[#allocation7 + $0xf0] sm:$0xff] %v266_v10  ;;  %v282_v10 = vadd.f32 %v218_v59, %v90_v48  ;;  %v161_v13 = vld [vmem:[#allocation5 + $0x1a8] sm:$0xff]  ;;  %v223_v15 = vmul.f32 %v159_v5, %v95_v4  ;;  %v98_v16 = vld [vmem:[#allocation2 + $0x1b0] sm:$0xff]  ;;  %v224_v19 = vmul.f32 %v160_v9, %v96_v8  ;;  %v99_v20 = vld [vmem:[#allocation2 + $0x1b8] sm:$0xff] }
  0x31   :  { %331 = vst [vmem:[#allocation7 + $0xf8] sm:$0xff] %v267_v14  ;;  %v283_v14 = vadd.f32 %v219_v63, %v91_v52  ;;  %v162_v17 = vld [vmem:[#allocation5 + $0x1b0] sm:$0xff]  ;;  %v163_v21 = vld [vmem:[#allocation5 + $0x1b8] sm:$0xff]  ;;  %v225_v23 = vmul.f32 %v161_v13, %v97_v12  ;;  %v100_v24 = vld [vmem:[#allocation2 + $0x1c0] sm:$0xff] }
  0x32   :  { %332 = vst [vmem:[#allocation7 + $0x100] sm:$0xff] %v268_v18  ;;  %v284_v18 = vadd.f32 %v220_v3, %v92_v56  ;;  %v164_v25 = vld [vmem:[#allocation5 + $0x1c0] sm:$0xff]  ;;  %v226_v27 = vmul.f32 %v162_v17, %v98_v16  ;;  %v101_v28 = vld [vmem:[#allocation2 + $0x1c8] sm:$0xff]  ;;  %v227_v31 = vmul.f32 %v163_v21, %v99_v20  ;;  %v102_v32 = vld [vmem:[#allocation2 + $0x1d0] sm:$0xff] }
  0x33   :  { %333 = vst [vmem:[#allocation7 + $0x108] sm:$0xff] %v269_v22  ;;  %v285_v22 = vadd.f32 %v221_v7, %v93_v60  ;;  %v165_v29 = vld [vmem:[#allocation5 + $0x1c8] sm:$0xff]  ;;  %v166_v33 = vld [vmem:[#allocation5 + $0x1d0] sm:$0xff]  ;;  %v228_v35 = vmul.f32 %v164_v25, %v100_v24  ;;  %v103_v36 = vld [vmem:[#allocation2 + $0x1d8] sm:$0xff] }
  0x34   :  { %334 = vst [vmem:[#allocation7 + $0x110] sm:$0xff] %v270_v26  ;;  %v286_v26 = vadd.f32 %v222_v11, %v94_v0  ;;  %v167_v37 = vld [vmem:[#allocation5 + $0x1d8] sm:$0xff]  ;;  %v229_v39 = vmul.f32 %v165_v29, %v101_v28  ;;  %v104_v40 = vld [vmem:[#allocation2 + $0x1e0] sm:$0xff]  ;;  %v230_v43 = vmul.f32 %v166_v33, %v102_v32  ;;  %v105_v44 = vld [vmem:[#allocation2 + $0x1e8] sm:$0xff] }
  0x35   :  { %335 = vst [vmem:[#allocation7 + $0x118] sm:$0xff] %v271_v30  ;;  %v287_v30 = vadd.f32 %v223_v15, %v95_v4  ;;  %v168_v41 = vld [vmem:[#allocation5 + $0x1e0] sm:$0xff]  ;;  %v169_v45 = vld [vmem:[#allocation5 + $0x1e8] sm:$0xff]  ;;  %v231_v47 = vmul.f32 %v167_v37, %v103_v36  ;;  %v106_v48 = vld [vmem:[#allocation2 + $0x1f0] sm:$0xff] }
  0x36   :  { %336 = vst [vmem:[#allocation7 + $0x120] sm:$0xff] %v272_v34  ;;  %v288_v34 = vadd.f32 %v224_v19, %v96_v8  ;;  %v170_v49 = vld [vmem:[#allocation5 + $0x1f0] sm:$0xff]  ;;  %v232_v51 = vmul.f32 %v168_v41, %v104_v40  ;;  %v107_v52 = vld [vmem:[#allocation2 + $0x1f8] sm:$0xff]  ;;  %v233_v55 = vmul.f32 %v169_v45, %v105_v44  ;;  %v294_v56 = vadd.f32 %v230_v43, %v102_v32 }
  0x37   :  { %337 = vst [vmem:[#allocation7 + $0x128] sm:$0xff] %v273_v38  ;;  %v289_v38 = vadd.f32 %v225_v23, %v97_v12  ;;  %v171_v53 = vld [vmem:[#allocation5 + $0x1f8] sm:$0xff]  ;;  %v234_v57 = vmul.f32 %v170_v49, %v106_v48 }
  0x38   :  { %338 = vst [vmem:[#allocation7 + $0x130] sm:$0xff] %v274_v42  ;;  %v290_v42 = vadd.f32 %v226_v27, %v98_v16  ;;  %v235_v59 = vmul.f32 %v171_v53, %v107_v52  ;;  %v296_v60 = vadd.f32 %v232_v51, %v104_v40  ;;  %v297_v61 = vadd.f32 %v233_v55, %v105_v44 }
  0x39   :  { %339 = vst [vmem:[#allocation7 + $0x138] sm:$0xff] %v275_v46  ;;  %v291_v46 = vadd.f32 %v227_v31, %v99_v20 }
  0x3a   :  { %340 = vst [vmem:[#allocation7 + $0x140] sm:$0xff] %v276_v50  ;;  %v292_v50 = vadd.f32 %v228_v35, %v100_v24  ;;  %v299_v63 = vadd.f32 %v235_v59, %v107_v52 }
  0x3b   :  { %341 = vst [vmem:[#allocation7 + $0x148] sm:$0xff] %v277_v54  ;;  %v293_v54 = vadd.f32 %v229_v39, %v101_v28 }
  0x3c   :  { %342 = vst [vmem:[#allocation7 + $0x150] sm:$0xff] %v278_v58  ;;  %v295_v58 = vadd.f32 %v231_v47, %v103_v36 }
  0x3d   :  { %343 = vst [vmem:[#allocation7 + $0x158] sm:$0xff] %v279_v62  ;;  %v298_v62 = vadd.f32 %v234_v57, %v106_v48 }
  0x3e   :  { %344 = vst [vmem:[#allocation7 + $0x160] sm:$0xff] %v280_v2 }
  0x3f   :  { %345 = vst [vmem:[#allocation7 + $0x168] sm:$0xff] %v281_v6 }
  0x40   :  { %346 = vst [vmem:[#allocation7 + $0x170] sm:$0xff] %v282_v10 }
  0x41   :  { %347 = vst [vmem:[#allocation7 + $0x178] sm:$0xff] %v283_v14 }
  0x42   :  { %348 = vst [vmem:[#allocation7 + $0x180] sm:$0xff] %v284_v18 }
  0x43   :  { %349 = vst [vmem:[#allocation7 + $0x188] sm:$0xff] %v285_v22 }
  0x44   :  { %350 = vst [vmem:[#allocation7 + $0x190] sm:$0xff] %v286_v26 }
  0x45   :  { %351 = vst [vmem:[#allocation7 + $0x198] sm:$0xff] %v287_v30 }
  0x46   :  { %352 = vst [vmem:[#allocation7 + $0x1a0] sm:$0xff] %v288_v34 }
  0x47   :  { %353 = vst [vmem:[#allocation7 + $0x1a8] sm:$0xff] %v289_v38 }
  0x48   :  { %354 = vst [vmem:[#allocation7 + $0x1b0] sm:$0xff] %v290_v42 }
  0x49   :  { %355 = vst [vmem:[#allocation7 + $0x1b8] sm:$0xff] %v291_v46 }
  0x4a   :  { %356 = vst [vmem:[#allocation7 + $0x1c0] sm:$0xff] %v292_v50 }
  0x4b   :  { %357 = vst [vmem:[#allocation7 + $0x1c8] sm:$0xff] %v293_v54 }
  0x4c   :  { %358 = vst [vmem:[#allocation7 + $0x1d0] sm:$0xff] %v294_v56 }
  0x4d   :  { %359 = vst [vmem:[#allocation7 + $0x1d8] sm:$0xff] %v295_v58 }
  0x4e   :  { %360 = vst [vmem:[#allocation7 + $0x1e0] sm:$0xff] %v296_v60 }
  0x4f   :  { %361 = vst [vmem:[#allocation7 + $0x1e8] sm:$0xff] %v297_v61 }
  0x50   :  { %362 = vst [vmem:[#allocation7 + $0x1f0] sm:$0xff] %v298_v62 }
  0x51   :  { %363 = vst [vmem:[#allocation7 + $0x1f8] sm:$0xff] %v299_v63 }
  0x52   :  { %376 = dma.vmem_to_hbm [thread:$0]  %s369_s1, 8192, %s371_s23, [#allocation4], %s468_s17, %s468_s17, %s469_s18  }
  0x53   :  { %465 = dma.done.wait [#allocation4], 8192  }
  0x54   :  { %466 = vsyncadd [#allocation4], 4294959104 }
  0x55   :  { %381 = vsyncpa [#allocation3], 1 }
  0x56   :  { %382 = vsyncpa [#allocation6], 1 }
  0x57   :  { %383 = vsyncpa [#allocation4], 1 }

</bundles_post_ra>
